<compile_context>
chip_gen: v6e
topology: v6e:2x2x1
jax: 0.10.0
libtpu: 0.0.40
codegen_flags: <defaults>
</compile_context>

<pallas_src>
import numpy as np
import jax
import jax.numpy as jnp
from jax.experimental import pallas as pl
from jax.experimental.pallas import tpu as pltpu

SLOPE = 0.1            # LeakyReLU(0.1)
MAX_LANE_TILE = 2048   # cap (multiple of 128) for the flattened-spatial lane tile


def _leaky(z):
    return jnp.where(z >= 0, z, SLOPE * z)


def ca_layer_forward(x, dvec, w1, w2):
    """CA_layer forward.

    x    : (B, C_out, H, W) feature map (NCHW, like the PyTorch module)   -> x[0]
    dvec : (B, C_in)        degradation representation                    -> x[1]
    w1   : (C_in//r, C_in)  Conv2d(C_in, C_in//r, 1, bias=False) weight[:, :, 0, 0]
    w2   : (C_out, C_in//r) Conv2d(C_in//r, C_out, 1, bias=False) weight[:, :, 0, 0]

    returns x * sigmoid(w2 @ leaky(w1 @ dvec^T)) broadcast over H, W.
    """
    B, C, H, W = x.shape
    Cin = dvec.shape[1]
    Cred = w1.shape[0]
    HW = H * W

    x2 = x.reshape(B, C, HW)   # channels on sublanes, flattened spatial on lanes
    dvecT = dvec.T             # (C_in, B): tiny, keeps attention in column layout

    # Lane (spatial) tiling: whole image in one block when small, else 128-aligned
    # tiles that keep the double-buffered working set small on every generation.
    tile = HW if HW <= MAX_LANE_TILE else MAX_LANE_TILE
    n_tiles = pl.cdiv(HW, tile)

    def kernel(dvt_ref, w1_ref, w2_ref, x_ref, o_ref):
        # Channel attention for all batches at once (N = B matmuls on the MXU).
        h = jnp.dot(w1_ref[...], dvt_ref[...],
                    preferred_element_type=jnp.float32)            # (Cred, B)
        h = _leaky(h)
        attT = jax.nn.sigmoid(
            jnp.dot(w2_ref[...], h, preferred_element_type=jnp.float32))  # (C, B)
        # Per-batch per-channel scale, broadcast over the lane (spatial) axis.
        for b in range(B):                                          # static unroll
            o_ref[b] = x_ref[b] * attT[:, b:b + 1]

    flops = int(n_tiles * 2 * B * (Cred * Cin + C * Cred) + B * C * HW)
    cost = pl.CostEstimate(
        flops=flops,
        transcendentals=int(n_tiles * B * (C + Cred)),
        bytes_accessed=int((2 * B * C * HW + Cin * B + Cred * Cin + C * Cred) * 4),
    )

    out = pl.pallas_call(
        kernel,
        grid=(n_tiles,),
        in_specs=[
            pl.BlockSpec((Cin, B), lambda s: (0, 0)),       # dvec^T (resident)
            pl.BlockSpec((Cred, Cin), lambda s: (0, 0)),    # W1     (resident)
            pl.BlockSpec((C, Cred), lambda s: (0, 0)),      # W2     (resident)
            pl.BlockSpec((B, C, tile), lambda s: (0, 0, s)),
        ],
        out_specs=pl.BlockSpec((B, C, tile), lambda s: (0, 0, s)),
        out_shape=jax.ShapeDtypeStruct((B, C, HW), jnp.float32),
        compiler_params=pltpu.CompilerParams(
            dimension_semantics=("parallel",)),
        cost_estimate=cost,
    )(dvecT, w1, w2, x2)

    return out.reshape(B, C, H, W)


# ------------------------------ test / driver -------------------------------

if __name__ == "__main__":
    key = jax.random.PRNGKey(0)
    kx, kd, k1, k2 = jax.random.split(key, 4)

    B, C, H, W = 2, 64, 8, 8
    RED = 8
    CRED = C // RED

    x0 = jax.random.normal(kx, (B, C, H, W), jnp.float32)      # x[0]: B*C*H*W
    dvec = jax.random.normal(kd, (B, C), jnp.float32)           # x[1]: B*C
    w1 = 0.1 * jax.random.normal(k1, (CRED, C), jnp.float32)    # Conv2d(C, C//r, 1), no bias
    w2 = 0.1 * jax.random.normal(k2, (C, CRED), jnp.float32)    # Conv2d(C//r, C, 1), no bias

    out = jax.jit(ca_layer_forward)(x0, dvec, w1, w2)
    out = jax.block_until_ready(out)

    # Pure-JAX reference of the same forward pass.
    att_ref = jax.nn.sigmoid(_leaky(dvec @ w1.T) @ w2.T)        # (B, C)
    ref = x0 * att_ref[:, :, None, None]

    assert out.shape == x0.shape and out.dtype == jnp.float32
    assert np.isfinite(np.asarray(out)).all()
    rel = float(jnp.max(jnp.abs(out - ref)) / (jnp.max(jnp.abs(ref)) + 1e-6))
    assert rel < 1e-2, f"mismatch vs reference: rel={rel}"

    print("KERNEL_OK")
</pallas_src>

<mosaic_0001>
module attributes {stable_mosaic.version = 11 : i64} {
  func.func @kernel(%arg0: i32, %arg1: memref<64x2xf32, #tpu.memory_space<vmem>>, %arg2: memref<8x64xf32, #tpu.memory_space<vmem>>, %arg3: memref<64x8xf32, #tpu.memory_space<vmem>>, %arg4: memref<2x64x64xf32, #tpu.memory_space<vmem>>, %arg5: memref<2x64x64xf32, #tpu.memory_space<vmem>>) attributes {dimension_semantics = [#tpu.dimension_semantics<parallel>], iteration_bounds = array<i64: 1>, scalar_prefetch = 0 : i64, scratch_operands = 0 : i64, tpu.core_type = #tpu.core_type<tc>, window_params = [{pipeline_mode = #tpu.pipeline_mode<synchronous>, transform_indices = @transform_0, window_bounds = array<i64: 64, 2>}, {pipeline_mode = #tpu.pipeline_mode<synchronous>, transform_indices = @transform_1, window_bounds = array<i64: 8, 64>}, {pipeline_mode = #tpu.pipeline_mode<synchronous>, transform_indices = @transform_2, window_bounds = array<i64: 64, 8>}, {transform_indices = @transform_3, window_bounds = array<i64: 2, 64, 64>}, {transform_indices = @transform_4, window_bounds = array<i64: 2, 64, 64>}]} {
    %c0 = arith.constant 0 : index
    %c0_0 = arith.constant 0 : index
    %0 = vector.load %arg2[%c0, %c0_0] : memref<8x64xf32, #tpu.memory_space<vmem>>, vector<8x64xf32>
    %c0_1 = arith.constant 0 : index
    %c0_2 = arith.constant 0 : index
    %1 = vector.load %arg1[%c0_1, %c0_2] : memref<64x2xf32, #tpu.memory_space<vmem>>, vector<64x2xf32>
    %cst = arith.constant dense<0.000000e+00> : vector<8x2xf32>
    %2 = tpu.matmul %0, %1, %cst {dimension_numbers = #tpu.dot_dimension_numbers<[1], [0], [0], [1], [0, 0, 1, 1], [], []>} : vector<8x64xf32>, vector<64x2xf32>, vector<8x2xf32> -> vector<8x2xf32>
    %cst_3 = arith.constant 0.000000e+00 : f32
    %3 = vector.broadcast %cst_3 : f32 to vector<8x2xf32>
    %4 = arith.cmpf oge, %2, %3 : vector<8x2xf32>
    %cst_4 = arith.constant 1.000000e-01 : f32
    %5 = vector.broadcast %cst_4 : f32 to vector<8x2xf32>
    %6 = arith.mulf %5, %2 : vector<8x2xf32>
    %7 = arith.select %4, %2, %6 : vector<8x2xi1>, vector<8x2xf32>
    %c0_5 = arith.constant 0 : index
    %c0_6 = arith.constant 0 : index
    %8 = vector.load %arg3[%c0_5, %c0_6] : memref<64x8xf32, #tpu.memory_space<vmem>>, vector<64x8xf32>
    %cst_7 = arith.constant dense<0.000000e+00> : vector<64x2xf32>
    %9 = tpu.matmul %8, %7, %cst_7 {dimension_numbers = #tpu.dot_dimension_numbers<[1], [0], [0], [1], [0, 0, 1, 1], [], []>} : vector<64x8xf32>, vector<8x2xf32>, vector<64x2xf32> -> vector<64x2xf32>
    %10 = arith.negf %9 : vector<64x2xf32>
    %11 = math.exp %10 : vector<64x2xf32>
    %cst_8 = arith.constant 1.000000e+00 : f32
    %12 = vector.broadcast %cst_8 : f32 to vector<64x2xf32>
    %13 = arith.addf %12, %11 : vector<64x2xf32>
    %14 = arith.divf %12, %13 : vector<64x2xf32>
    %c0_9 = arith.constant 0 : index
    %c0_10 = arith.constant 0 : index
    %c0_11 = arith.constant 0 : index
    %15 = vector.load %arg4[%c0_9, %c0_10, %c0_11] : memref<2x64x64xf32, #tpu.memory_space<vmem>>, vector<1x64x64xf32>
    %16 = vector.shape_cast %15 : vector<1x64x64xf32> to vector<64x64xf32>
    %17 = vector.extract_strided_slice %14 {offsets = [0, 0], sizes = [64, 1], strides = [1, 1]} : vector<64x2xf32> to vector<64x1xf32>
    %18 = vector.broadcast %17 : vector<64x1xf32> to vector<64x64xf32>
    %19 = arith.mulf %16, %18 : vector<64x64xf32>
    %c0_12 = arith.constant 0 : index
    %c0_13 = arith.constant 0 : index
    %c0_14 = arith.constant 0 : index
    %20 = vector.load %arg5[%c0_12, %c0_13, %c0_14] : memref<2x64x64xf32, #tpu.memory_space<vmem>>, vector<1x64x64xf32>
    %21 = vector.shape_cast %20 : vector<1x64x64xf32> to vector<64x64xf32>
    %22 = vector.shape_cast %19 : vector<64x64xf32> to vector<1x64x64xf32>
    tpu.vector_store %arg5[%c0_12, %c0_13, %c0_14], %22 {strides = array<i32>} : memref<2x64x64xf32, #tpu.memory_space<vmem>>, vector<1x64x64xf32>,
    %c1 = arith.constant 1 : index
    %c0_15 = arith.constant 0 : index
    %c0_16 = arith.constant 0 : index
    %23 = vector.load %arg4[%c1, %c0_15, %c0_16] : memref<2x64x64xf32, #tpu.memory_space<vmem>>, vector<1x64x64xf32>
    %24 = vector.shape_cast %23 : vector<1x64x64xf32> to vector<64x64xf32>
    %25 = vector.extract_strided_slice %14 {offsets = [0, 1], sizes = [64, 1], strides = [1, 1]} : vector<64x2xf32> to vector<64x1xf32>
    %26 = vector.broadcast %25 : vector<64x1xf32> to vector<64x64xf32>
    %27 = arith.mulf %24, %26 : vector<64x64xf32>
    %c1_17 = arith.constant 1 : index
    %c0_18 = arith.constant 0 : index
    %c0_19 = arith.constant 0 : index
    %28 = vector.load %arg5[%c1_17, %c0_18, %c0_19] : memref<2x64x64xf32, #tpu.memory_space<vmem>>, vector<1x64x64xf32>
    %29 = vector.shape_cast %28 : vector<1x64x64xf32> to vector<64x64xf32>
    %30 = vector.shape_cast %27 : vector<64x64xf32> to vector<1x64x64xf32>
    tpu.vector_store %arg5[%c1_17, %c0_18, %c0_19], %30 {strides = array<i32>} : memref<2x64x64xf32, #tpu.memory_space<vmem>>, vector<1x64x64xf32>,
    return
  }
  func.func @transform_0(%arg0: i32) -> (i32, i32) {
    %c0_i32 = arith.constant 0 : i32
    %c0_i32_0 = arith.constant 0 : i32
    %c0_i32_1 = arith.constant 0 : i32
    return %c0_i32, %c0_i32_0 : i32, i32
  }
  func.func @transform_1(%arg0: i32) -> (i32, i32) {
    %c0_i32 = arith.constant 0 : i32
    %c0_i32_0 = arith.constant 0 : i32
    %c0_i32_1 = arith.constant 0 : i32
    return %c0_i32, %c0_i32_0 : i32, i32
  }
  func.func @transform_2(%arg0: i32) -> (i32, i32) {
    %c0_i32 = arith.constant 0 : i32
    %c0_i32_0 = arith.constant 0 : i32
    %c0_i32_1 = arith.constant 0 : i32
    return %c0_i32, %c0_i32_0 : i32, i32
  }
  func.func @transform_3(%arg0: i32) -> (i32, i32, i32) {
    %c0_i32 = arith.constant 0 : i32
    %c0_i32_0 = arith.constant 0 : i32
    %c0_i32_1 = arith.constant 0 : i32
    return %c0_i32, %c0_i32_0, %arg0 : i32, i32, i32
  }
  func.func @transform_4(%arg0: i32) -> (i32, i32, i32) {
    %c0_i32 = arith.constant 0 : i32
    %c0_i32_0 = arith.constant 0 : i32
    %c0_i32_1 = arith.constant 0 : i32
    return %c0_i32, %c0_i32_0, %arg0 : i32, i32, i32
  }
}

</mosaic_0001>

<bundles_post_ra>
// kernel: ca_layer_forward.1
= control target key start
LH: loop header
LB: loop body
LE: loop exit
PB: predicated region body
PF: predicated region fallthrough
CT: control target
= control target key end

     0   :  { %v546_v0 = vmov 0.0   ;;  %vm547_vm0 = vmmov 0   ;;  %vm26_vm1 = vcmask 523264   ;;  %vm111_vm2 = vcmask 64512   ;;  %s758_s0 = inlined_call_operand.vmem [shape: f32[64,2], index: 0, kind: input, shape index: {}]   ;;  %s759_s1 = inlined_call_operand.vmem [shape: f32[8,64], index: 1, kind: input, shape index: {}]   ;;  %s760_s2 = inlined_call_operand.vmem [shape: f32[64,8], index: 2, kind: input, shape index: {}]   ;;  %s761_s3 = inlined_call_operand.vmem [shape: f32[2,64,64], index: 3, kind: input, shape index: {}]   ;;  %s762_s4 = inlined_call_operand.vmem [shape: f32[2,64,64], index: 4, kind: output, shape index: {}]  }
   0x1   :  { %466 = vmatprep.subr.mxu0 %v546_v0  ;;  %v25_v1 = vld [vmem:[%s758_s0 + $0x38] sm:$0xff]  ;;  %v24_v2 = vld [vmem:[%s758_s0 + $0x30] sm:$0xff]  ;;  %482 = vmatprep.mubr.msk.f32.mxu0 %vm547_vm0, %v546_v0  ;;  %v23_v3 = vld [vmem:[%s758_s0 + $0x28] sm:$0xff]  ;;  %v548_v22 = vmov 1   ;;  %v549_v23 = vmov 0  }
   0x2   :  { %467 = vmatpush3.msra.mxu0 %v25_v1  ;;  %v22_v4 = vld [vmem:[%s758_s0 + $0x20] sm:$0xff]  ;;  %v21_v5 = vld [vmem:[%s758_s0 + $0x18] sm:$0xff]  ;;  %v20_v6 = vld [vmem:[%s758_s0 + $0x10] sm:$0xff]  ;;  %504 = vset.pattern.permute.xlu1 %v548_v22 }
   0x3   :  { %468 = vmatprep.subr.mxu0 %v546_v0  ;;  %v19_v7 = vld [vmem:[%s758_s0 + $0x8] sm:$0xff]  ;;  %v18_v8 = vld [vmem:[%s758_s0] sm:$0xff]  ;;  %v105_v16 = vld [vmem:[%s760_s2 + $0x10] sm:$0xff]  ;;  %503 = vset.pattern.permute.xlu0 %v549_v23 }
   0x4   :  { %469 = vmatpush3.msra.mxu0 %v24_v2  ;;  %v17_v9 = vld [vmem:[%s759_s1] sm:$0xff]  ;;  %v104_v15 = vld [vmem:[%s760_s2 + $0x8] sm:$0xff]  ;;  %v106_v17 = vld [vmem:[%s760_s2 + $0x18] sm:$0xff] }
   0x5   :  { %470 = vmatprep.subr.mxu0 %v546_v0  ;;  %v103_v10 = vld [vmem:[%s760_s2] sm:$0xff]  ;;  %v108_v19 = vld [vmem:[%s760_s2 + $0x28] sm:$0xff]  ;;  %v109_v20 = vld [vmem:[%s760_s2 + $0x30] sm:$0xff] }
   0x6   :  { %471 = vmatpush3.msra.mxu0 %v23_v3  ;;  %487 = vmatprep.mubr.msk.f32.mxu1 %vm111_vm2, %v103_v10  ;;  %v107_v18 = vld [vmem:[%s760_s2 + $0x20] sm:$0xff]  ;;  %v110_v21 = vld [vmem:[%s760_s2 + $0x38] sm:$0xff]  ;;  %v290_v1 = vld [vmem:[%s761_s3 + $0x8] sm:$0xff] }
   0x7   :  { %472 = vmatprep.subr.mxu0 %v546_v0 }
   0x8   :  { %473 = vmatpush3.msra.mxu0 %v22_v4 }
   0x9   :  { %474 = vmatprep.subr.mxu0 %v546_v0 }
   0xa   :  { %475 = vmatpush3.msra.mxu0 %v21_v5 }
   0xb   :  { %476 = vmatprep.subr.mxu0 %v546_v0 }
   0xc   :  { %477 = vmatpush3.msra.mxu0 %v20_v6  ;;  %v289_v6 = vld [vmem:[%s761_s3] sm:$0xff] }
   0xd   :  { %478 = vmatprep.subr.mxu0 %v546_v0 }
   0xe   :  { %479 = vmatpush3.msra.mxu0 %v19_v7  ;;  %v292_v7 = vld [vmem:[%s761_s3 + $0x18] sm:$0xff] }
   0xf   :  { %480 = vmatprep.subr.mxu0 %v546_v0  ;;  %v433_v0 = vld [vmem:[%s761_s3 + $0x48] sm:$0xff] }
  0x10   :  { %481 = vmatpush3.msra.mxu0 %v18_v8 }
  0x11   :  { %483 = vmatmul.mubr.msk.f32.vlgmr.msra.gmra.mxu0 %vm26_vm1, %v17_v9 }
  0xd1   :  { %v96_v11 = vpop.f32.mrf.mxu0 }
  0xd2   :  { %v101_v12 = vmul.f32 0.1, %v96_v11  ;;  %vm100_vm3 = vcmp.ge.f32.partialorder %v96_v11, 0.0 }
  0xd3   :  { %v484_v13 = vpop.f32.mrf.mxu0 }
  0xd4   :  { %v102_v14 = vsel %vm100_vm3, %v96_v11, %v101_v12  ;;  %v432_v12 = vld [vmem:[%s761_s3 + $0x40] sm:$0xff]  ;;  %v291_v13 = vld [vmem:[%s761_s3 + $0x10] sm:$0xff] }
  0xd5   :  { %485 = vmatprep.subr.mxu1 %v102_v14 }
  0xd6   :  { %486 = vmatpush3.msra.mxu1 %v102_v14 }
  0xd7   :  { %488 = vmatmul.mubr.msk.f32.vlgmr.msra.gmra.mxu1 %vm111_vm2, %v104_v15 }
  0xd8   :  { %490 = vmatprep.mubr.msk.f32.mxu1 %vm111_vm2, %v105_v16 }
  0xdb   :  { %491 = vmatmul.mubr.msk.f32.gmra.mxu1 %vm111_vm2, %v106_v17 }
  0xdc   :  { %493 = vmatprep.mubr.msk.f32.mxu1 %vm111_vm2, %v107_v18  ;;  %v435_v18 = vld [vmem:[%s761_s3 + $0x58] sm:$0xff] }
  0xdf   :  { %494 = vmatmul.mubr.msk.f32.gmra.mxu1 %vm111_vm2, %v108_v19  ;;  %v434_v19 = vld [vmem:[%s761_s3 + $0x50] sm:$0xff] }
  0xe0   :  { %496 = vmatprep.mubr.msk.f32.mxu1 %vm111_vm2, %v109_v20 }
  0xe3   :  { %497 = vmatmul.mubr.msk.f32.gmra.mxu1 %vm111_vm2, %v110_v21 }
 0x197   :  { %v489_v24 = vpop.f32.mrf.mxu1 }
 0x198   :  { %v425_v25 = vmul.f32 -1.442695, %v489_v24  ;;  %v437_v24 = vld [vmem:[%s761_s3 + $0x68] sm:$0xff] }
 0x199   :  { %v202_v26 = vpop.f32.mrf.mxu1 }
 0x19a   :  { %514 = vpow2.f32 %v425_v25  ;;  %v424_v27 = vmul.f32 -1.442695, %v202_v26  ;;  %v294_v26 = vld [vmem:[%s761_s3 + $0x28] sm:$0xff] }
 0x19b   :  { %v492_v28 = vpop.f32.mrf.mxu1 }
 0x19c   :  { %516 = vpow2.f32 %v424_v27  ;;  %v427_v29 = vmul.f32 -1.442695, %v492_v28 }
 0x19d   :  { %v212_v30 = vpop.f32.mrf.mxu1 }
 0x19e   :  { %518 = vpow2.f32 %v427_v29  ;;  %v426_v31 = vmul.f32 -1.442695, %v212_v30  ;;  %v293_v30 = vld [vmem:[%s761_s3 + $0x20] sm:$0xff] }
 0x19f   :  { %v495_v32 = vpop.f32.mrf.mxu1 }
 0x1a0   :  { %520 = vpow2.f32 %v426_v31  ;;  %v429_v33 = vmul.f32 -1.442695, %v495_v32  ;;  %v436_v32 = vld [vmem:[%s761_s3 + $0x60] sm:$0xff] }
 0x1a1   :  { %v222_v34 = vpop.f32.mrf.mxu1 }
 0x1a2   :  { %522 = vpow2.f32 %v429_v33  ;;  %v428_v38 = vmul.f32 -1.442695, %v222_v34 }
 0x1a3   :  { %v498_v35 = vpop.f32.mrf.mxu1 }
 0x1a4   :  { %v431_v46 = vmul.f32 -1.442695, %v498_v35  ;;  %v295_v35 = vld [vmem:[%s761_s3 + $0x30] sm:$0xff] }
 0x1a5   :  { %v232_v36 = vpop.f32.mrf.mxu1 }
 0x1a6   :  { %v430_v40 = vmul.f32 -1.442695, %v232_v36 }
 0x1a7   :  { %v515_v37 = vpop.eup %514 }
 0x1a8   :  { %v266_v39 = vadd.f32 1.0, %v515_v37 }
 0x1a9   :  { %v517_v41 = vpop.eup %516 }
 0x1aa   :  { %524 = vrcp.f32 %v266_v39  ;;  %v265_v42 = vadd.f32 1.0, %v517_v41  ;;  %v296_v39 = vld [vmem:[%s761_s3 + $0x38] sm:$0xff] }
 0x1ab   :  { %v519_v43 = vpop.eup %518  ;;  %526 = vpow2.f32 %v428_v38  ;;  %v439_v41 = vld [vmem:[%s761_s3 + $0x78] sm:$0xff] }
 0x1ac   :  { %v268_v44 = vadd.f32 1.0, %v519_v43  ;;  %528 = vpow2.f32 %v430_v40 }
 0x1ad   :  { %v521_v45 = vpop.eup %520  ;;  %530 = vrcp.f32 %v265_v42 }
 0x1ae   :  { %532 = vrcp.f32 %v268_v44  ;;  %v267_v47 = vadd.f32 1.0, %v521_v45  ;;  %v438_v45 = vld [vmem:[%s761_s3 + $0x70] sm:$0xff] }
 0x1af   :  { %v523_v48 = vpop.eup %522  ;;  %534 = vpow2.f32 %v431_v46 }
 0x1b0   :  { %536 = vrcp.f32 %v267_v47  ;;  %v270_v49 = vadd.f32 1.0, %v523_v48 }
 0x1b2   :  { %538 = vrcp.f32 %v270_v49 }
 0x1b7   :  { %v525_v50 = vpop.eup %524 }
 0x1b8   :  { %v527_v51 = vpop.eup %526  ;;  %367 = vperm.xlu1 %504, %v525_v50   ;;  %304 = vperm.xlu0 %503, %v525_v50  }
 0x1b9   :  { %v529_v52 = vpop.eup %528  ;;  %v269_v55 = vadd.f32 1.0, %v527_v51 }
 0x1ba   :  { %v531_v53 = vpop.eup %530  ;;  %v271_v56 = vadd.f32 1.0, %v529_v52 }
 0x1bb   :  { %v533_v54 = vpop.eup %532  ;;  %540 = vrcp.f32 %v269_v55 }
 0x1bc   :  { %506 = vset.pattern.permute.xlu1 %v549_v23  ;;  %299 = vperm.xlu0 %503, %v531_v53   ;;  %v535_v57 = vpop.eup %534  ;;  %542 = vrcp.f32 %v271_v56 }
 0x1bd   :  { %314 = vperm.xlu1 %506, %v533_v54   ;;  %v537_v58 = vpop.eup %536  ;;  %v272_v59 = vadd.f32 1.0, %v535_v57 }
 0x1bf   :  { %v539_v60 = vpop.eup %538  ;;  %544 = vrcp.f32 %v272_v59 }
 0x1c0   :  { %505 = vset.pattern.permute.xlu0 %v548_v22 }
 0x1c1   :  { %363 = vperm.xlu0 %505, %v531_v53   ;;  %309 = vperm.xlu1 %506, %v537_v58  }
 0x1c5   :  { %375 = vperm.xlu0 %505, %v533_v54   ;;  %507 = vset.pattern.permute.xlu1 %v548_v22 }
 0x1c6   :  { %371 = vperm.xlu1 %507, %v537_v58  }
 0x1c8   :  { %v541_v61 = vpop.eup %540 }
 0x1c9   :  { %383 = vperm.xlu0 %505, %v539_v60   ;;  %v543_v62 = vpop.eup %542 }
 0x1ca   :  { %508 = vset.pattern.permute.xlu1 %v549_v23 }
 0x1cb   :  { %324 = vperm.xlu1 %508, %v539_v60  }
 0x1cc   :  { %v545_v63 = vpop.eup %544 }
 0x1cd   :  { %509 = vset.pattern.permute.xlu0 %v549_v23 }
 0x1ce   :  { %319 = vperm.xlu0 %509, %v541_v61  }
 0x1cf   :  { %510 = vset.pattern.permute.xlu1 %v548_v22 }
 0x1d0   :  { %379 = vperm.xlu1 %510, %v541_v61  }
 0x1d2   :  { %329 = vperm.xlu0 %509, %v543_v62  }
 0x1d4   :  { %511 = vset.pattern.permute.xlu1 %v549_v23 }
 0x1d5   :  { %334 = vperm.xlu1 %511, %v545_v63  }
 0x1d6   :  { %513 = vset.pattern.permute.xlu0 %v548_v22 }
 0x1d7   :  { %391 = vperm.xlu0 %513, %v545_v63  }
 0x1d9   :  { %512 = vset.pattern.permute.xlu1 %v548_v22 }
 0x1da   :  { %387 = vperm.xlu1 %512, %v543_v62  }
 0x233   :  { %v368_v2 = vpop.permute.xlu1 %367  ;;  %v305_v3 = vpop.permute.xlu0 %304 }
 0x234   :  { %v395_v4 = vmul.f32 %v433_v0, %v368_v2  ;;  %v338_v5 = vmul.f32 %v305_v3, %v290_v1 }
 0x236   :  { %441 = vst.msk [vmem:[%s762_s4 + $0x48] sm:$0xff] %vm26_vm1, %v395_v4  ;;  %346 = vst.msk [vmem:[%s762_s4 + $0x8] sm:$0xff] %vm26_vm1, %v338_v5 }
 0x237   :  { %v300_v8 = vpop.permute.xlu0 %299 }
 0x238   :  { %v337_v9 = vmul.f32 %v300_v8, %v289_v6  ;;  %v315_v10 = vpop.permute.xlu1 %314 }
 0x239   :  { %v340_v11 = vmul.f32 %v315_v10, %v292_v7 }
 0x23a   :  { %345 = vst.msk [vmem:[%s762_s4] sm:$0xff] %vm26_vm1, %v337_v9 }
 0x23b   :  { %348 = vst.msk [vmem:[%s762_s4 + $0x18] sm:$0xff] %vm26_vm1, %v340_v11 }
 0x23c   :  { %v364_v14 = vpop.permute.xlu0 %363  ;;  %v310_v15 = vpop.permute.xlu1 %309 }
 0x23d   :  { %v394_v16 = vmul.f32 %v432_v12, %v364_v14  ;;  %v339_v17 = vmul.f32 %v310_v15, %v291_v13 }
 0x23f   :  { %440 = vst.msk [vmem:[%s762_s4 + $0x40] sm:$0xff] %vm26_vm1, %v394_v16  ;;  %347 = vst.msk [vmem:[%s762_s4 + $0x10] sm:$0xff] %vm26_vm1, %v339_v17 }
 0x240   :  { %v376_v20 = vpop.permute.xlu0 %375 }
 0x241   :  { %v397_v21 = vmul.f32 %v435_v18, %v376_v20  ;;  %v372_v22 = vpop.permute.xlu1 %371 }
 0x242   :  { %v396_v23 = vmul.f32 %v434_v19, %v372_v22 }
 0x243   :  { %443 = vst.msk [vmem:[%s762_s4 + $0x58] sm:$0xff] %vm26_vm1, %v397_v21 }
 0x244   :  { %442 = vst.msk [vmem:[%s762_s4 + $0x50] sm:$0xff] %vm26_vm1, %v396_v23  ;;  %v384_v25 = vpop.permute.xlu0 %383 }
 0x245   :  { %v399_v27 = vmul.f32 %v437_v24, %v384_v25 }
 0x246   :  { %v325_v28 = vpop.permute.xlu1 %324 }
 0x247   :  { %445 = vst.msk [vmem:[%s762_s4 + $0x68] sm:$0xff] %vm26_vm1, %v399_v27  ;;  %v342_v29 = vmul.f32 %v325_v28, %v294_v26 }
 0x249   :  { %350 = vst.msk [vmem:[%s762_s4 + $0x28] sm:$0xff] %vm26_vm1, %v342_v29  ;;  %v320_v31 = vpop.permute.xlu0 %319 }
 0x24a   :  { %v341_v33 = vmul.f32 %v320_v31, %v293_v30 }
 0x24b   :  { %v380_v34 = vpop.permute.xlu1 %379 }
 0x24c   :  { %349 = vst.msk [vmem:[%s762_s4 + $0x20] sm:$0xff] %vm26_vm1, %v341_v33  ;;  %v398_v36 = vmul.f32 %v436_v32, %v380_v34 }
 0x24d   :  { %v330_v37 = vpop.permute.xlu0 %329 }
 0x24e   :  { %444 = vst.msk [vmem:[%s762_s4 + $0x60] sm:$0xff] %vm26_vm1, %v398_v36  ;;  %v343_v38 = vmul.f32 %v330_v37, %v295_v35 }
 0x250   :  { %351 = vst.msk [vmem:[%s762_s4 + $0x30] sm:$0xff] %vm26_vm1, %v343_v38  ;;  %v335_v40 = vpop.permute.xlu1 %334 }
 0x251   :  { %v344_v42 = vmul.f32 %v335_v40, %v296_v39 }
 0x252   :  { %v392_v43 = vpop.permute.xlu0 %391 }
 0x253   :  { %352 = vst.msk [vmem:[%s762_s4 + $0x38] sm:$0xff] %vm26_vm1, %v344_v42  ;;  %v401_v44 = vmul.f32 %v439_v41, %v392_v43 }
 0x255   :  { %447 = vst.msk [vmem:[%s762_s4 + $0x78] sm:$0xff] %vm26_vm1, %v401_v44  ;;  %v388_v46 = vpop.permute.xlu1 %387 }
 0x256   :  { %v400_v47 = vmul.f32 %v438_v45, %v388_v46 }
 0x258   :  { %446 = vst.msk [vmem:[%s762_s4 + $0x70] sm:$0xff] %vm26_vm1, %v400_v47 }

</bundles_post_ra>
